<compile_context>
chip_gen: v7x
topology: tpu7x:2x2x1
jax: 0.10.0
libtpu: 0.0.40
codegen_flags: <defaults>
</compile_context>

<pallas_src>
import functools

import jax
import jax.numpy as jnp
from jax.experimental import pallas as pl
from jax.experimental.pallas import tpu as pltpu


def dpr_loss_kernel(q_ref, d_ref, out_ref, *, inv_n):
    i = pl.program_id(0)
    tq = q_ref.shape[0]

    q = q_ref[...]                       # [tq, n_dim], native dtype (bf16 ok)
    d = d_ref[...]                       # [n_docs, n_dim], native dtype, resident

    # NT matmul on the MXU (contract last dims), f32 accumulation:
    #   scores[r, c] = <q_r, doc_c>
    scores = jax.lax.dot_general(
        q, d, dimension_numbers=(((1,), (1,)), ((), ())),
        preferred_element_type=jnp.float32)               # [tq, n_docs] f32

    # max-stabilized log-sum-exp over docs; keep everything 2-D [tq, 1], f32.
    m = jnp.max(scores, axis=1, keepdims=True)            # [tq, 1]
    lse = m + jnp.log(jnp.sum(jnp.exp(scores - m), axis=1, keepdims=True))

    # Positive score for query row r is scores[r, i*tq + r] (empty-cache
    # semantics: positive doc of query i is doc row i).  The positive rows are
    # already in the VMEM-resident doc block: ref-slice them (no HBM traffic),
    # recompute just that [tq, tq] block on the MXU (same operands, same f32
    # accumulation -> consistent with `scores`), mask out the diagonal.
    start = pl.multiple_of(i * tq, tq)
    d_pos = d_ref[pl.ds(start, tq), :]                    # [tq, n_dim]
    blk = jax.lax.dot_general(
        q, d_pos, dimension_numbers=(((1,), (1,)), ((), ())),
        preferred_element_type=jnp.float32)               # [tq, tq] f32
    row = jax.lax.broadcasted_iota(jnp.int32, (tq, tq), 0)
    col = jax.lax.broadcasted_iota(jnp.int32, (tq, tq), 1)
    diag = jnp.sum(jnp.where(row == col, blk, 0.0),
                   axis=1, keepdims=True)                 # [tq, 1]

    partial = jnp.sum(lse - diag)                         # scalar f32

    @pl.when(i == 0)
    def _init():
        out_ref[0, 0] = 0.0

    out_ref[0, 0] += partial

    @pl.when(i == pl.num_programs(0) - 1)
    def _finalize():
        out_ref[0, 0] *= inv_n


def _pick_tq(bs):
    # Largest divisor of bs that is <= 256 and a multiple of 8 (fills the
    # 256-wide v6e/v7x MXU when possible, matches v5e's 128-wide MXU
    # otherwise); degenerate to the whole (small) batch if no such divisor.
    best = None
    for t in range(8, min(bs, 256) + 1, 8):
        if bs % t == 0:
            best = t
    return best if best is not None else bs


def dpr_loss(query_embedding, doc_embedding, *, tq=None):
    bs, n_dim = query_embedding.shape
    n_docs, n_dim_d = doc_embedding.shape
    assert n_dim == n_dim_d and n_docs >= bs

    if tq is None:
        tq = _pick_tq(bs)
    assert bs % tq == 0
    n_tiles = bs // tq

    # VMEM budget: resident doc block (single-buffered) + double-buffered q
    # tiles + f32 scores/exp temporaries + headroom.
    doc_bytes = n_docs * n_dim * doc_embedding.dtype.itemsize
    q_bytes = 2 * tq * n_dim * query_embedding.dtype.itemsize
    f32_tmp = 3 * tq * n_docs * 4 + tq * tq * 4
    vmem_limit = int(min(max(doc_bytes + q_bytes + f32_tmp + (4 << 20),
                             16 << 20), 100 << 20))

    kernel = functools.partial(dpr_loss_kernel, inv_n=1.0 / bs)

    out = pl.pallas_call(
        kernel,
        out_shape=jax.ShapeDtypeStruct((1, 1), jnp.float32),
        grid=(n_tiles,),
        in_specs=[
            # query rows: streamed tile per grid step (double-buffered).
            pl.BlockSpec((tq, n_dim), lambda i: (i, 0)),
            # full doc matrix: constant index_map -> fetched once, resident;
            # single-buffered to halve its VMEM footprint.
            pl.BlockSpec((n_docs, n_dim), lambda i: (0, 0),
                         pipeline_mode=pl.Buffered(1)),
        ],
        # Scalar loss accumulates in SMEM (no padded (8,128) VMEM tile).
        out_specs=pl.BlockSpec(memory_space=pltpu.MemorySpace.SMEM),
        # Output is an accumulator across the batch axis -> "arbitrary".
        compiler_params=pltpu.CompilerParams(
            dimension_semantics=("arbitrary",),
            vmem_limit_bytes=vmem_limit),
    )(query_embedding, doc_embedding)
    return out[0, 0]


def dpr_loss_ref(query_embedding, doc_embedding):
    q = query_embedding.astype(jnp.float32)
    d = doc_embedding.astype(jnp.float32)
    scores = q @ d.T
    logp = jax.nn.log_softmax(scores, axis=1)
    labels = jnp.arange(query_embedding.shape[0])
    return -jnp.mean(logp[labels, labels])


if __name__ == "__main__":
    key = jax.random.PRNGKey(0)
    k_q, k_d = jax.random.split(key)
    bs, n_dim = 8, 128
    # query: [bs, n_dim]; doc: [bs*2, n_dim] (positive + hard-negative halves).
    # bf16 inputs: the kernel feeds them to the MXU directly (f32 accumulate).
    query_embedding = jax.random.normal(
        k_q, (bs, n_dim), dtype=jnp.float32).astype(jnp.bfloat16)
    doc_embedding = jax.random.normal(
        k_d, (2 * bs, n_dim), dtype=jnp.float32).astype(jnp.bfloat16)

    loss = dpr_loss(query_embedding, doc_embedding)
    jax.block_until_ready(loss)

    ref = dpr_loss_ref(query_embedding, doc_embedding)
    assert jnp.allclose(loss, ref, rtol=1e-3, atol=1e-3), (loss, ref)

    print("KERNEL_OK")
</pallas_src>

<mosaic_0001>
module attributes {stable_mosaic.version = 11 : i64} {
  func.func @dpr_loss_kernel(%arg0: i32, %arg1: memref<8x128xbf16, #tpu.memory_space<vmem>>, %arg2: memref<16x128xbf16, #tpu.memory_space<vmem>>, %arg3: memref<1x1xf32, #tpu.memory_space<smem>>) attributes {dimension_semantics = [#tpu.dimension_semantics<arbitrary>], iteration_bounds = array<i64: 1>, scalar_prefetch = 0 : i64, scratch_operands = 0 : i64, tpu.core_type = #tpu.core_type<tc>, window_params = [{transform_indices = @transform_0, window_bounds = array<i64: 8, 128>}, {pipeline_mode = #tpu.pipeline_mode<synchronous>, transform_indices = @transform_1, window_bounds = array<i64: 16, 128>}, {transform_indices = @transform_2, window_bounds = array<i64: 1, 1>}]} {
    %c0 = arith.constant 0 : index
    %c0_0 = arith.constant 0 : index
    %0 = vector.load %arg1[%c0, %c0_0] : memref<8x128xbf16, #tpu.memory_space<vmem>>, vector<8x128xbf16>
    %c0_1 = arith.constant 0 : index
    %c0_2 = arith.constant 0 : index
    %1 = vector.load %arg2[%c0_1, %c0_2] : memref<16x128xbf16, #tpu.memory_space<vmem>>, vector<16x128xbf16>
    %cst = arith.constant dense<0.000000e+00> : vector<8x16xf32>
    %2 = tpu.matmul %0, %1, %cst {dimension_numbers = #tpu.dot_dimension_numbers<[1], [1], [0], [0], [0, 0, 1, 0], [], []>} : vector<8x128xbf16>, vector<16x128xbf16>, vector<8x16xf32> -> vector<8x16xf32>
    %cst_3 = arith.constant dense<0xFF800000> : vector<8xf32>
    %3 = vector.multi_reduction <maximumf>, %2, %cst_3 [1] : vector<8x16xf32> to vector<8xf32>
    %4 = vector.shape_cast %3 : vector<8xf32> to vector<8x1xf32>
    %5 = vector.broadcast %4 : vector<8x1xf32> to vector<8x16xf32>
    %6 = arith.subf %2, %5 : vector<8x16xf32>
    %7 = math.exp %6 : vector<8x16xf32>
    %cst_4 = arith.constant dense<0.000000e+00> : vector<8xf32>
    %8 = vector.multi_reduction <add>, %7, %cst_4 [1] : vector<8x16xf32> to vector<8xf32>
    %9 = vector.shape_cast %8 : vector<8xf32> to vector<8x1xf32>
    %10 = math.log %9 : vector<8x1xf32>
    %11 = arith.addf %4, %10 : vector<8x1xf32>
    %c8_i32 = arith.constant 8 : i32
    %12 = arith.muli %arg0, %c8_i32 : i32
    %13 = tpu.assume_multiple %12, 8 : i32
    %14 = arith.index_cast %13 : i32 to index
    %c0_5 = arith.constant 0 : index
    %15 = vector.load %arg2[%14, %c0_5] : memref<16x128xbf16, #tpu.memory_space<vmem>>, vector<8x128xbf16>
    %cst_6 = arith.constant dense<0.000000e+00> : vector<8x8xf32>
    %16 = tpu.matmul %0, %15, %cst_6 {dimension_numbers = #tpu.dot_dimension_numbers<[1], [1], [0], [0], [0, 0, 1, 0], [], []>} : vector<8x128xbf16>, vector<8x128xbf16>, vector<8x8xf32> -> vector<8x8xf32>
    %17 = tpu.iota {dimensions = array<i32: 0>} : vector<8x8xi32>
    %18 = tpu.iota {dimensions = array<i32: 1>} : vector<8x8xi32>
    %19 = arith.cmpi eq, %17, %18 : vector<8x8xi32>
    %cst_7 = arith.constant 0.000000e+00 : f32
    %20 = vector.broadcast %cst_7 : f32 to vector<8x8xf32>
    %21 = arith.select %19, %16, %20 : vector<8x8xi1>, vector<8x8xf32>
    %cst_8 = arith.constant dense<0.000000e+00> : vector<8xf32>
    %22 = vector.multi_reduction <add>, %21, %cst_8 [1] : vector<8x8xf32> to vector<8xf32>
    %23 = vector.shape_cast %22 : vector<8xf32> to vector<8x1xf32>
    %24 = arith.subf %11, %23 : vector<8x1xf32>
    %25 = vector.shape_cast %24 : vector<8x1xf32> to vector<1x8x1xf32>
    %cst_9 = arith.constant dense<0.000000e+00> : vector<1xf32>
    %26 = vector.multi_reduction <add>, %25, %cst_9 [1, 2] : vector<1x8x1xf32> to vector<1xf32>
    %27 = vector.shape_cast %26 : vector<1xf32> to vector<1x1x1xf32>
    %28 = vector.extract %27[0, 0, 0] : f32 from vector<1x1x1xf32>
    %c0_i32 = arith.constant 0 : i32
    %29 = arith.cmpi eq, %arg0, %c0_i32 : i32
    %30 = arith.extui %29 : i1 to i32
    %c0_i32_10 = arith.constant 0 : i32
    %31 = arith.cmpi ne, %30, %c0_i32_10 : i32
    scf.if %31 {
      %cst_17 = arith.constant 0.000000e+00 : f32
      %c0_18 = arith.constant 0 : index
      %c0_19 = arith.constant 0 : index
      %38 = memref.load %arg3[%c0_18, %c0_19] : memref<1x1xf32, #tpu.memory_space<smem>>
      memref.store %cst_17, %arg3[%c0_18, %c0_19] : memref<1x1xf32, #tpu.memory_space<smem>>
    } else {
    }
    %c0_11 = arith.constant 0 : index
    %c0_12 = arith.constant 0 : index
    %32 = memref.load %arg3[%c0_11, %c0_12] : memref<1x1xf32, #tpu.memory_space<smem>>
    %33 = arith.addf %32, %28 : f32
    %c0_13 = arith.constant 0 : index
    %c0_14 = arith.constant 0 : index
    %34 = memref.load %arg3[%c0_13, %c0_14] : memref<1x1xf32, #tpu.memory_space<smem>>
    memref.store %33, %arg3[%c0_13, %c0_14] : memref<1x1xf32, #tpu.memory_space<smem>>
    %c0_i32_15 = arith.constant 0 : i32
    %35 = arith.cmpi eq, %arg0, %c0_i32_15 : i32
    %36 = arith.extui %35 : i1 to i32
    %c0_i32_16 = arith.constant 0 : i32
    %37 = arith.cmpi ne, %36, %c0_i32_16 : i32
    scf.if %37 {
      %c0_17 = arith.constant 0 : index
      %c0_18 = arith.constant 0 : index
      %38 = memref.load %arg3[%c0_17, %c0_18] : memref<1x1xf32, #tpu.memory_space<smem>>
      %cst_19 = arith.constant 1.250000e-01 : f32
      %39 = arith.mulf %38, %cst_19 : f32
      %c0_20 = arith.constant 0 : index
      %c0_21 = arith.constant 0 : index
      %40 = memref.load %arg3[%c0_20, %c0_21] : memref<1x1xf32, #tpu.memory_space<smem>>
      memref.store %39, %arg3[%c0_20, %c0_21] : memref<1x1xf32, #tpu.memory_space<smem>>
    } else {
    }
    return
  }
  func.func @transform_0(%arg0: i32) -> (i32, i32) {
    %c0_i32 = arith.constant 0 : i32
    %c0_i32_0 = arith.constant 0 : i32
    return %arg0, %c0_i32 : i32, i32
  }
  func.func @transform_1(%arg0: i32) -> (i32, i32) {
    %c0_i32 = arith.constant 0 : i32
    %c0_i32_0 = arith.constant 0 : i32
    %c0_i32_1 = arith.constant 0 : i32
    return %c0_i32, %c0_i32_0 : i32, i32
  }
  func.func @transform_2(%arg0: i32) -> (i32, i32) {
    %c0_i32 = arith.constant 0 : i32
    %c0_i32_0 = arith.constant 0 : i32
    %c0_i32_1 = arith.constant 0 : i32
    return %c0_i32, %c0_i32_0 : i32, i32
  }
}

</mosaic_0001>

<bundles_post_ra>
// kernel: tpu_custom_call.1
= control target key start
LH: loop header
LB: loop body
LE: loop exit
PB: predicated region body
PF: predicated region fallthrough
CT: control target
= control target key end

     0   :  { %7 = vsyncpa [#allocation3], 0  ;;  %s361_s0 = inlined_call_operand.hbm [shape: bf16[8,128], index: 0, kind: input, shape index: {}]   ;;  %s362_s1 = inlined_call_operand.hbm [shape: bf16[16,128], index: 1, kind: input, shape index: {}]   ;;  %s363_s2 = inlined_call_operand.hbm [shape: f32[1,1], index: 2, kind: output, shape index: {}]  }
   0x1   :  { %8 = vsyncpa [#allocation6], 0 }
   0x2   :  { %9 = vsyncpa [#allocation4], 0  ;;  %s294_s9 = smov [#allocation2]   ;;  %s295_s11 = smov [#allocation5]  }
   0x3   :  { %s16_s10 = sshll.u32 %s294_s9, 4  ;;  %s25_s12 = sshll.u32 %s295_s11, 4  ;;  %s17_s10 = int_to_ptr.vmem [resolvable:$true] %s16_s10  ;;  %s316_s12 = int_to_ptr.vmem [resolvable:$true] %s25_s12 }
   0x4   :  { %s234_s15 = scalar_lea.hbm %s361_s0, 64 }
   0x5   :  { %p235_p0 = scmp.ne.s32.totalorder %s361_s0, %s234_s15  ;;  %p238_p1 = scmp.lt.u32.totalorder %s234_s15, %s361_s0 }
   0x7   :  { %p240_p2 = pnand %p238_p1, %p235_p0 }
   0x9   :  { %243 = shalt.err (!%p240_p2)
}
   0xa   :  { %s244_s20 = scalar_lea.vmem %s17_s10, 64  ;;  %p249_p4 = scmp.lt.s32.totalorder %s17_s10, %s17_s10 }
   0xb   :  { %p245_p3 = scmp.ne.s32.totalorder %s17_s10, %s244_s20  ;;  %p250_p5 = scmp.lt.s32.totalorder %s244_s20, %s244_s20 }
   0xd   :  { %p251_p6 = por %p250_p5, %p249_p4 }
   0xf   :  { %p252_p7 = pnand %p251_p6, %p245_p3 }
  0x11   :  { %255 = shalt.err (!%p252_p7)
}
  0x12   :  { %19 = dma.hbm_to_vmem [thread:$0]  %s361_s0, 64, %s17_s10, [#allocation3]  }
  0x13   :  { %s256_s25 = scalar_lea.hbm %s362_s1, 128 }
  0x14   :  { %p257_p8 = scmp.ne.s32.totalorder %s362_s1, %s256_s25  ;;  %p260_p9 = scmp.lt.u32.totalorder %s256_s25, %s362_s1 }
  0x16   :  { %p262_p10 = pnand %p260_p9, %p257_p8 }
  0x18   :  { %265 = shalt.err (!%p262_p10)
}
  0x19   :  { %s266_s30 = scalar_lea.vmem %s316_s12, 128  ;;  %p271_p12 = scmp.lt.s32.totalorder %s316_s12, %s316_s12 }
  0x1a   :  { %p267_p11 = scmp.ne.s32.totalorder %s316_s12, %s266_s30  ;;  %p272_p13 = scmp.lt.s32.totalorder %s266_s30, %s266_s30 }
  0x1c   :  { %p273_p0 = por %p272_p13, %p271_p12 }
  0x1e   :  { %p274_p1 = pnand %p273_p0, %p267_p11 }
  0x20   :  { %277 = shalt.err (!%p274_p1)
}
  0x21   :  { %s296_s0 = smov 64   ;;  %s297_s3 = smov 4  }
  0x22   :  { %31 = dma.hbm_to_vmem [thread:$0]  %s362_s1, 128, %s316_s12, [#allocation6], %s296_s0, %s296_s0, %s297_s3  }
  0x23   :  { %288 = dma.done.wait [#allocation3], 64  }
  0x24   :  { %289 = vsyncadd [#allocation3], 4294967232 }
  0x25   :  { %290 = dma.done.wait [#allocation6], 128  }
  0x26   :  { %291 = vsyncadd [#allocation6], 4294967168  ;;  %v298_v0 = vmov 0.0   ;;  %vm299_vm0 = vmmov 0   ;;  %v229_v1 = vld [vmem:[#allocation5] sm:$0xff]   ;;  %vm88_vm1 = vcmask 130048   ;;  %v147_v10 = vlaneseq }
  0x27   :  { %207 = vmatprep.subr.bf16.mxu0 %v298_v0  ;;  %209 = vmatprep.mubr.msk.bf16.mxu0 %vm299_vm0, %v298_v0  ;;  %v106_v2 = vld [vmem:[#allocation5] sm:$0xf]  ;;  %v39_v3 = vld [vmem:[#allocation2] sm:$0xf]  ;;  %vm153_vm2 = vcmask 64512   ;;  %vm158_vm4 = vcmask 7168  }
  0x28   :  { %213 = vmatprep.subr.bf16.mxu1 %v298_v0  ;;  %215 = vmatprep.mubr.msk.bf16.mxu1 %vm299_vm0, %v298_v0  ;;  %v148_v12 = vshrl.u32 %v147_v10, 7  ;;  %v150_v13 = vand.u32 127, %v147_v10  ;;  %s278_s9 = scalar_lea.hbm %s363_s2, 16 }
  0x29   :  { %208 = vmatpush3.bf16.xpose.msra.mxu0 %v229_v1  ;;  %214 = vmatpush3.bf16.xpose.msra.mxu1 %v106_v2  ;;  %p279_p2 = scmp.ne.s32.totalorder %s363_s2, %s278_s9  ;;  %p282_p3 = scmp.lt.u32.totalorder %s278_s9, %s363_s2 }
  0x2a   :  { %vm151_vm3 = vcmp.eq.s32.totalorder %v148_v12, %v150_v13 }
  0x2b   :  { %p284_p4 = pnand %p282_p3, %p279_p2 }
  0x30   :  { %210 = vmatmul.mubr.bf16.vlgmr.msra.gmra.mrb[0].mxu0 %v39_v3  ;;  %216 = vmatmul.mubr.bf16.vlgmr.msra.gmra.mrb[0].mxu1 %v39_v3 }
 0x103   :  { %v82_v4 = vpop.f32.mrb[0].mxu0  ;;  %v141_v9 = vpop.f32.mrb[0].mxu1 }
 0x104   :  { %v211_v5 = vpop.f32.mrb[1].mxu0  ;;  %v89_v6 = vsel %vm88_vm1, %v82_v4, -inf  ;;  %v217_v11 = vpop.f32.mrb[1].mxu1  ;;  %v152_v16 = vsel %vm151_vm3, %v141_v9, 0.0 }
 0x105   :  { %90 = vmax.xlane.f32.xlu0 %v89_v6  ;;  %v85_v7 = vpop.f32.mrb[2].mxu0  ;;  %v144_v14 = vpop.f32.mrb[2].mxu1  ;;  %v154_v17 = vsel %vm153_vm2, %v152_v16, 0.0 }
 0x106   :  { %v212_v8 = vpop.f32.mrb[3].mxu0  ;;  %v218_v15 = vpop.f32.mrb[3].mxu1  ;;  %155 = vadd.xlane.f32.xlu1 %v154_v17 }
 0x192   :  { %v91_v18 = vpop.xlane.xlu0 %90 }
 0x193   :  { %v92_v19 = vsub.f32 %v82_v4, %v91_v18  ;;  %v156_v26 = vpop.xlane.xlu1 %155 }
 0x195   :  { %v93_v20 = vmul.f32 1.442695, %v92_v19 }
 0x197   :  { %230 = vpow2.f32 %v93_v20 }
 0x1a1   :  { %v231_v21 = vpop.eup %230 }
 0x1a2   :  { %v95_v22 = vsel %vm88_vm1, %v231_v21, 0.0 }
 0x1a3   :  { %96 = vadd.xlane.f32.xlu0 %v95_v22 }
 0x230   :  { %v97_v23 = vpop.xlane.xlu0 %96 }
 0x231   :  { %232 = vlog2.f32 %v97_v23 }
 0x23b   :  { %v233_v24 = vpop.eup %232 }
 0x23c   :  { %v99_v25 = vmul.f32 0.6931472, %v233_v24 }
 0x23e   :  { %v100_v27 = vadd.f32 %v99_v25, %v91_v18 }
 0x240   :  { %v157_v28 = vsub.f32 %v100_v27, %v156_v26 }
 0x242   :  { %v159_v29 = vsel %vm158_vm4, %v157_v28, 0.0 }
 0x243   :  { %160 = vadd.xlane.f32.xlu1 %v159_v29 }
 0x2d0   :  { %v161_v30 = vpop.xlane.xlu1 %160 }
 0x2d1   :  { %v162_v31 = vrot.slane %v161_v30, 4 }
 0x2d3   :  { %v163_v32 = vadd.f32 %v162_v31, %v161_v30 }
 0x2d5   :  { %v164_v33 = vrot.slane %v163_v32, 2 }
 0x2d7   :  { %v165_v34 = vadd.f32 %v164_v33, %v163_v32 }
 0x2d9   :  { %v166_v35 = vrot.slane %v165_v34, 1 }
 0x2db   :  { %v167_v36 = vadd.f32 %v166_v35, %v165_v34 }
 0x2dd   :  { %219 = vpush %v167_v36 }
 0x30e   :  { %s220_s1 = spop %219 }
 0x30f   :  { %s183_s6 = smul.f32 0.125, %s220_s1 }
 0x311   :  { %184 = sst [smem:[#allocation7]] %s183_s6 }
 0x312   :  { %287 = shalt.err (!%p284_p4)
}
 0x313   :  { %s300_s14 = smov [#allocation7]  }
 0x314   :  { %192 = dma.smem_to_hbm %s300_s14, 16, %s363_s2, [#allocation4]  }
 0x315   :  { %292 = dma.done.wait [#allocation4], 16  }
 0x316   :  { %293 = vsyncadd [#allocation4], 4294967280 }
 0x317   :  { %196 = sfence }
 0x318   :  { %197 = vsyncpa [#allocation3], 1 }
 0x319   :  { %198 = vsyncpa [#allocation6], 1 }
 0x31a   :  { %199 = vsyncpa [#allocation4], 1 }

</bundles_post_ra>
